<compile_context>
chip_gen: v6e
topology: v6e:2x2x1
jax: 0.10.0
libtpu: 0.0.40
codegen_flags: <defaults>
</compile_context>

<pallas_src>
import math
import functools

import jax
import jax.numpy as jnp
from jax import lax
from jax.experimental import pallas as pl
from jax.experimental.pallas import tpu as pltpu


def _vmem_limit_bytes():
    """Generation-aware scoped-VMEM limit (v5e/v6e: 128 MiB phys, v7x: 64 MiB)."""
    cap = 64 * 1024 * 1024
    try:
        cap = int(getattr(pltpu.get_tpu_info(), "vmem_capacity_bytes", cap))
    except Exception:
        pass
    return min((cap * 3) // 4, 100 * 1024 * 1024)


def _round_up(x, m):
    return ((x + m - 1) // m) * m


# ----------------------------------------------------------------------------
# Unmasked path, phase 1:  kv[h] = sum_j kn_j^T @ v_j   (per-head (D, D))
# f32 scratch accumulation, bf16 writeback at the last kv tile.
# ----------------------------------------------------------------------------
def _kv_accum_kernel(k_ref, v_ref, kv_ref, acc_ref):
    j = pl.program_id(1)

    @pl.when(j == 0)
    def _():
        acc_ref[...] = jnp.zeros_like(acc_ref)

    # kn^T @ v without a materialized transpose: contract the row axis of both.
    acc_ref[...] += lax.dot_general(
        k_ref[0], v_ref[0], (((0,), (0,)), ((), ())),
        preferred_element_type=jnp.float32)

    @pl.when(j == pl.num_programs(1) - 1)
    def _():
        kv_ref[0] = acc_ref[...].astype(kv_ref.dtype)


# ----------------------------------------------------------------------------
# Unmasked path, phase 2:  out_tile = qn_scaled_tile @ kv[h]   (bf16 in, f32 acc)
# ----------------------------------------------------------------------------
def _q_times_kv_kernel(q_ref, kv_ref, o_ref):
    o_ref[0] = jnp.dot(q_ref[0], kv_ref[0],
                       preferred_element_type=jnp.float32).astype(o_ref.dtype)


# ----------------------------------------------------------------------------
# Masked path: tiled (flash-style, but no softmax -> plain running sum).
# Large Q block per grid step; 128-row sub-tiles inside the kernel.
# ----------------------------------------------------------------------------
def _masked_sim_kernel(q_ref, k_ref, v_ref, m_ref, o_ref, acc_ref, *,
                       mask_per_head, sub, n_sub):
    j = pl.program_id(2)

    @pl.when(j == 0)
    def _():
        acc_ref[...] = jnp.zeros_like(acc_ref)

    kb = k_ref[0]      # (tk, D) bf16, pre-normalized
    vb = v_ref[0]      # (tk, D) bf16

    # Static Python loop over `sub`-row Q sub-tiles keeps the live (sub, tk)
    # f32 score small; the big Q block cuts K/V re-streaming by tq/sub.
    for si in range(n_sub):
        r = si * sub
        qsub = q_ref[0, r:r + sub, :]                              # (sub, D) bf16
        s = lax.dot_general(qsub, kb, (((1,), (1,)), ((), ())),
                            preferred_element_type=jnp.float32)    # (sub, tk) f32
        msub = (m_ref[0, r:r + sub, :] if mask_per_head
                else m_ref[r:r + sub, :])                          # int8, no f32 cast
        s = jnp.where(msub == 0, jnp.float32(-10000.0), s)
        # NOTE: -10000 rounds to -9984 in bf16 for the s @ v matmul (~0.16% on
        # masked terms); acceptable under the test tolerance.
        acc_ref[r:r + sub, :] += jnp.dot(s.astype(jnp.bfloat16), vb,
                                         preferred_element_type=jnp.float32)

    @pl.when(j == pl.num_programs(2) - 1)
    def _():
        o_ref[0] = acc_ref[...].astype(o_ref.dtype)


# ----------------------------------------------------------------------------
# Wrapper
# ----------------------------------------------------------------------------
def sim_attention(q, k, v, mask=None, use_l1_norm=True,
                  block_q=512, block_kv=128, sub_q=128):
    """Pallas TPU implementation of SimAttention.forward.

    q, k, v: (B, H, L, D).  mask: optional, broadcastable to (B, H, L, L);
    score is set to -10000 where mask == 0 (exactly like the PyTorch module,
    no softmax afterwards).
    """
    B, H, L, D = k.shape
    BH = B * H
    inv_sqrt_d = 1.0 / math.sqrt(D)
    out_dtype = q.dtype
    vmem_limit = _vmem_limit_bytes()

    # ---- prologue: normalize once (wrapper-level, XLA-fused), stream bf16 ----
    if use_l1_norm:
        nq = jnp.sum(jnp.abs(q), axis=-1, keepdims=True)
        nk = jnp.sum(jnp.abs(k), axis=-1, keepdims=True)
    else:
        nq = jnp.sqrt(jnp.sum(q * q, axis=-1, keepdims=True))
        nk = jnp.sqrt(jnp.sum(k * k, axis=-1, keepdims=True))
    # 1/sqrt(D) folded into q; zero-norm rows give inf/NaN exactly like torch.
    qn = ((q / nq) * inv_sqrt_d).astype(jnp.bfloat16).reshape(BH, L, D)
    kn = (k / nk).astype(jnp.bfloat16).reshape(BH, L, D)
    vb = v.astype(jnp.bfloat16).reshape(BH, L, D)

    if mask is None:
        # ---- associativity rewrite: out = qn_scaled @ (kn^T @ v), O(L*D^2) ----
        blk = min(512, _round_up(L, 128))
        Lp = _round_up(L, blk)
        if Lp != L:  # pad AFTER normalization: padded rows are exact zeros
            pad = [(0, 0), (0, Lp - L), (0, 0)]
            qn = jnp.pad(qn, pad)
            kn = jnp.pad(kn, pad)
            vb = jnp.pad(vb, pad)
        nblk = Lp // blk

        kv_mat = pl.pallas_call(
            _kv_accum_kernel,
            out_shape=jax.ShapeDtypeStruct((BH, D, D), jnp.bfloat16),
            grid_spec=pltpu.PrefetchScalarGridSpec(
                num_scalar_prefetch=0,
                grid=(BH, nblk),
                in_specs=[pl.BlockSpec((1, blk, D), lambda h, j: (h, j, 0)),
                          pl.BlockSpec((1, blk, D), lambda h, j: (h, j, 0))],
                out_specs=pl.BlockSpec((1, D, D), lambda h, j: (h, 0, 0)),
                scratch_shapes=[pltpu.VMEM((D, D), jnp.float32)],
            ),
            compiler_params=pltpu.CompilerParams(
                dimension_semantics=("parallel", "arbitrary"),
                vmem_limit_bytes=vmem_limit),
        )(kn, vb)
        # TODO(synk): when BH == 1 on v7x, split the kv reduction into two
        #             halves so both TensorCores stay busy.

        out = pl.pallas_call(
            _q_times_kv_kernel,
            out_shape=jax.ShapeDtypeStruct((BH, Lp, D), out_dtype),
            grid_spec=pltpu.PrefetchScalarGridSpec(
                num_scalar_prefetch=0,
                grid=(BH, nblk),
                in_specs=[pl.BlockSpec((1, blk, D), lambda h, i: (h, i, 0)),
                          pl.BlockSpec((1, D, D), lambda h, i: (h, 0, 0))],
                out_specs=pl.BlockSpec((1, blk, D), lambda h, i: (h, i, 0)),
            ),
            compiler_params=pltpu.CompilerParams(
                dimension_semantics=("parallel", "parallel"),
                vmem_limit_bytes=vmem_limit),
        )(qn, kv_mat)
    else:
        # ---- masked path: tiled accumulation over kv tiles ----
        tq = min(block_q, _round_up(L, sub_q))
        tq = _round_up(tq, sub_q)
        tk = block_kv if (tq % block_kv == 0) else sub_q
        Lp = _round_up(L, tq)           # tq % tk == 0  ->  Lp % tk == 0
        if Lp != L:
            pad = [(0, 0), (0, Lp - L), (0, 0)]
            qn = jnp.pad(qn, pad)
            kn = jnp.pad(kn, pad)
            vb = jnp.pad(vb, pad)
        nq_t = Lp // tq
        nkv_t = Lp // tk
        n_sub = tq // sub_q

        m = jnp.asarray(mask)
        while m.ndim < 4:
            m = m[None]
        mask_per_head = (m.shape[0] != 1) or (m.shape[1] != 1)
        if mask_per_head:
            # per-batch/head masks: (BH, Lp, Lp) int8 (can be large for long L)
            mf = (jnp.broadcast_to(m, (B, H, L, L)) != 0).astype(jnp.int8)
            mf = mf.reshape(BH, L, L)
            mf = jnp.pad(mf, [(0, 0), (0, Lp - L), (0, Lp - L)])
            m_spec = pl.BlockSpec((1, tq, tk), lambda h, i, j: (h, i, j))
        else:
            # shared mask stays (Lp, Lp) int8, same block for every head
            mf = (jnp.broadcast_to(m[0, 0], (L, L)) != 0).astype(jnp.int8)
            mf = jnp.pad(mf, [(0, Lp - L), (0, Lp - L)])
            m_spec = pl.BlockSpec((tq, tk), lambda h, i, j: (i, j))

        out = pl.pallas_call(
            functools.partial(_masked_sim_kernel, mask_per_head=mask_per_head,
                              sub=sub_q, n_sub=n_sub),
            out_shape=jax.ShapeDtypeStruct((BH, Lp, D), out_dtype),
            grid_spec=pltpu.PrefetchScalarGridSpec(
                num_scalar_prefetch=0,
                grid=(BH, nq_t, nkv_t),
                in_specs=[pl.BlockSpec((1, tq, D), lambda h, i, j: (h, i, 0)),
                          pl.BlockSpec((1, tk, D), lambda h, i, j: (h, j, 0)),
                          pl.BlockSpec((1, tk, D), lambda h, i, j: (h, j, 0)),
                          m_spec],
                out_specs=pl.BlockSpec((1, tq, D), lambda h, i, j: (h, i, 0)),
                scratch_shapes=[pltpu.VMEM((tq, D), jnp.float32)],
            ),
            compiler_params=pltpu.CompilerParams(
                dimension_semantics=("parallel", "parallel", "arbitrary"),
                vmem_limit_bytes=vmem_limit),
        )(qn, kn, vb, mf)

    if Lp != L:
        out = out[:, :L, :]
    return out.reshape(B, H, L, D)


# ----------------------------------------------------------------------------
# Pure-JAX f32 reference matching the PyTorch forward exactly
# ----------------------------------------------------------------------------
def _reference(q, k, v, mask=None, use_l1_norm=True):
    d = k.shape[-1]
    if use_l1_norm:
        nq = jnp.sum(jnp.abs(q), axis=-1, keepdims=True)
        nk = jnp.sum(jnp.abs(k), axis=-1, keepdims=True)
    else:
        nq = jnp.linalg.norm(q, axis=-1, keepdims=True)
        nk = jnp.linalg.norm(k, axis=-1, keepdims=True)
    qn = q / nq
    kn = k / nk
    score = jnp.einsum("bhld,bhmd->bhlm", qn, kn) / math.sqrt(d)
    if mask is not None:
        score = jnp.where(mask == 0, -10000.0, score)
    return jnp.einsum("bhlm,bhmd->bhld", score, v)


def _rel_err(a, b):
    return float(jnp.max(jnp.abs(a - b)) / (jnp.max(jnp.abs(b)) + 1e-6))


if __name__ == "__main__":
    # Small but non-trivial shapes: L=256 exercises real tiling, D=128 keeps
    # the output lane-dense.
    B, H, L, D = 2, 2, 256, 128
    key = jax.random.PRNGKey(0)
    kq, kk, kv_ = jax.random.split(key, 3)
    q = jax.random.normal(kq, (B, H, L, D), dtype=jnp.float32)
    k = jax.random.normal(kk, (B, H, L, D), dtype=jnp.float32)
    v = jax.random.normal(kv_, (B, H, L, D), dtype=jnp.float32)

    # 1) L1-norm variant (module default), no mask -> associativity path
    out_l1 = jax.block_until_ready(sim_attention(q, k, v, mask=None,
                                                 use_l1_norm=True))
    ref_l1 = _reference(q, k, v, mask=None, use_l1_norm=True)
    e1 = _rel_err(out_l1, ref_l1)
    assert e1 < 5e-2, f"unmasked L1 path mismatch: rel_err={e1}"

    # 2) L2-norm variant with a shared causal mask -> tiled masked kernel
    mask = jnp.tril(jnp.ones((1, 1, L, L), dtype=jnp.int32))
    out_l2 = jax.block_until_ready(sim_attention(q, k, v, mask=mask,
                                                 use_l1_norm=False))
    ref_l2 = _reference(q, k, v, mask=mask, use_l1_norm=False)
    e2 = _rel_err(out_l2, ref_l2)
    assert e2 < 5e-2, f"masked L2 path mismatch: rel_err={e2}"

    # 3) non-divisible L (exercises the padding path), masked, L1 norm
    L2_ = 200
    q3 = jax.random.normal(kq, (1, 2, L2_, D), dtype=jnp.float32)
    k3 = jax.random.normal(kk, (1, 2, L2_, D), dtype=jnp.float32)
    v3 = jax.random.normal(kv_, (1, 2, L2_, D), dtype=jnp.float32)
    mask3 = jnp.tril(jnp.ones((1, 1, L2_, L2_), dtype=jnp.int32))
    out3 = jax.block_until_ready(sim_attention(q3, k3, v3, mask=mask3,
                                               use_l1_norm=True))
    ref3 = _reference(q3, k3, v3, mask=mask3, use_l1_norm=True)
    e3 = _rel_err(out3, ref3)
    assert e3 < 5e-2, f"padded masked L1 path mismatch: rel_err={e3}"

    print("KERNEL_OK")
</pallas_src>

<mosaic_0001>
module attributes {stable_mosaic.version = 11 : i64} {
  func.func @_kv_accum_kernel(%arg0: i32, %arg1: i32, %arg2: memref<1x256x128xbf16, #tpu.memory_space<vmem>>, %arg3: memref<1x256x128xbf16, #tpu.memory_space<vmem>>, %arg4: memref<1x128x128xbf16, #tpu.memory_space<vmem>>, %arg5: memref<128x128xf32, #tpu.memory_space<vmem>>) attributes {dimension_semantics = [#tpu.dimension_semantics<parallel>, #tpu.dimension_semantics<arbitrary>], iteration_bounds = array<i64: 4, 1>, scalar_prefetch = 0 : i64, scratch_operands = 1 : i64, tpu.core_type = #tpu.core_type<tc>, window_params = [{transform_indices = @transform_0, window_bounds = array<i64: 1, 256, 128>}, {transform_indices = @transform_1, window_bounds = array<i64: 1, 256, 128>}, {transform_indices = @transform_2, window_bounds = array<i64: 1, 128, 128>}]} {
    %c0_i32 = arith.constant 0 : i32
    %0 = arith.cmpi eq, %arg1, %c0_i32 : i32
    %1 = arith.extui %0 : i1 to i32
    %c0_i32_0 = arith.constant 0 : i32
    %2 = arith.cmpi ne, %1, %c0_i32_0 : i32
    scf.if %2 {
      %cst_12 = arith.constant 0.000000e+00 : f32
      %14 = vector.broadcast %cst_12 : f32 to vector<128x128xf32>
      %c0_13 = arith.constant 0 : index
      %c0_14 = arith.constant 0 : index
      %15 = vector.load %arg5[%c0_13, %c0_14] : memref<128x128xf32, #tpu.memory_space<vmem>>, vector<128x128xf32>
      tpu.vector_store %arg5[%c0_13, %c0_14], %14 {strides = array<i32>} : memref<128x128xf32, #tpu.memory_space<vmem>>, vector<128x128xf32>,
    } else {
    }
    %c0 = arith.constant 0 : index
    %c0_1 = arith.constant 0 : index
    %3 = vector.load %arg5[%c0, %c0_1] : memref<128x128xf32, #tpu.memory_space<vmem>>, vector<128x128xf32>
    %c0_2 = arith.constant 0 : index
    %c0_3 = arith.constant 0 : index
    %c0_4 = arith.constant 0 : index
    %4 = vector.load %arg2[%c0_2, %c0_3, %c0_4] : memref<1x256x128xbf16, #tpu.memory_space<vmem>>, vector<1x256x128xbf16>
    %5 = vector.shape_cast %4 : vector<1x256x128xbf16> to vector<256x128xbf16>
    %c0_5 = arith.constant 0 : index
    %c0_6 = arith.constant 0 : index
    %c0_7 = arith.constant 0 : index
    %6 = vector.load %arg3[%c0_5, %c0_6, %c0_7] : memref<1x256x128xbf16, #tpu.memory_space<vmem>>, vector<1x256x128xbf16>
    %7 = vector.shape_cast %6 : vector<1x256x128xbf16> to vector<256x128xbf16>
    %cst = arith.constant dense<0.000000e+00> : vector<128x128xf32>
    %8 = tpu.matmul %5, %7, %cst {dimension_numbers = #tpu.dot_dimension_numbers<[0], [0], [1], [1], [0, 1, 1, 1], [], []>} : vector<256x128xbf16>, vector<256x128xbf16>, vector<128x128xf32> -> vector<128x128xf32>
    %9 = arith.addf %3, %8 : vector<128x128xf32>
    %c0_8 = arith.constant 0 : index
    %c0_9 = arith.constant 0 : index
    %10 = vector.load %arg5[%c0_8, %c0_9] : memref<128x128xf32, #tpu.memory_space<vmem>>, vector<128x128xf32>
    tpu.vector_store %arg5[%c0_8, %c0_9], %9 {strides = array<i32>} : memref<128x128xf32, #tpu.memory_space<vmem>>, vector<128x128xf32>,
    %c0_i32_10 = arith.constant 0 : i32
    %11 = arith.cmpi eq, %arg1, %c0_i32_10 : i32
    %12 = arith.extui %11 : i1 to i32
    %c0_i32_11 = arith.constant 0 : i32
    %13 = arith.cmpi ne, %12, %c0_i32_11 : i32
    scf.if %13 {
      %c0_12 = arith.constant 0 : index
      %c0_13 = arith.constant 0 : index
      %14 = vector.load %arg5[%c0_12, %c0_13] : memref<128x128xf32, #tpu.memory_space<vmem>>, vector<128x128xf32>
      %15 = arith.truncf %14 : vector<128x128xf32> to vector<128x128xbf16>
      %c0_14 = arith.constant 0 : index
      %c0_15 = arith.constant 0 : index
      %c0_16 = arith.constant 0 : index
      %16 = vector.load %arg4[%c0_14, %c0_15, %c0_16] : memref<1x128x128xbf16, #tpu.memory_space<vmem>>, vector<1x128x128xbf16>
      %17 = vector.shape_cast %16 : vector<1x128x128xbf16> to vector<128x128xbf16>
      %18 = vector.shape_cast %15 : vector<128x128xbf16> to vector<1x128x128xbf16>
      tpu.vector_store %arg4[%c0_14, %c0_15, %c0_16], %18 {strides = array<i32>} : memref<1x128x128xbf16, #tpu.memory_space<vmem>>, vector<1x128x128xbf16>,
    } else {
    }
    return
  }
  func.func @transform_0(%arg0: i32, %arg1: i32) -> (i32, i32, i32) {
    %c0_i32 = arith.constant 0 : i32
    %c0_i32_0 = arith.constant 0 : i32
    return %arg0, %arg1, %c0_i32 : i32, i32, i32
  }
  func.func @transform_1(%arg0: i32, %arg1: i32) -> (i32, i32, i32) {
    %c0_i32 = arith.constant 0 : i32
    %c0_i32_0 = arith.constant 0 : i32
    return %arg0, %arg1, %c0_i32 : i32, i32, i32
  }
  func.func @transform_2(%arg0: i32, %arg1: i32) -> (i32, i32, i32) {
    %c0_i32 = arith.constant 0 : i32
    %c0_i32_0 = arith.constant 0 : i32
    %c0_i32_1 = arith.constant 0 : i32
    return %arg0, %c0_i32, %c0_i32_0 : i32, i32, i32
  }
}

</mosaic_0001>

<bundles_post_ra>
// kernel: tpu_custom_call.1
= control target key start
LH: loop header
LB: loop body
LE: loop exit
PB: predicated region body
PF: predicated region fallthrough
CT: control target
= control target key end

     0   :  { %7 = vsyncpa [#allocation4], 0  ;;  %s1608_s0 = inlined_call_operand.hbm [shape: bf16[4,256,128], index: 0, kind: input, shape index: {}]   ;;  %s1609_s1 = inlined_call_operand.hbm [shape: bf16[4,256,128], index: 1, kind: input, shape index: {}]   ;;  %s1610_s2 = inlined_call_operand.hbm [shape: bf16[4,128,128], index: 2, kind: output, shape index: {}]  }
   0x1   :  { %9 = vsyncpa [#allocation4 + $0x1], 0 }
   0x2   :  { %10 = vsyncpa [#allocation7], 0 }
   0x3   :  { %12 = vsyncpa [#allocation7 + $0x1], 0 }
   0x4   :  { %13 = vsyncpa [#allocation5], 0 }
   0x5   :  { %15 = vsyncpa [#allocation5 + $0x1], 0  ;;  %s1381_s9 = smov 0   ;;  %s1383_s10 = smov 0  }
   0x6   :  { %s1385_s11 = smov 0   ;;  %s1387_s12 = smov 0  }
   0x7   :  { %s1389_s13 = smov 0   ;;  %s1391_s14 = smov 0  }
   0x8 LB: > { %s901_s15 = sadd.s32 4294967295, %s1357_s14   ;;  %s902_s16 = sadd.s32 4294967294, %s1357_s14   ;;  %s1357_s14 = sphi %s1391_s14, %s21_s14   ;;  %s1353_s13 = sphi %s1389_s13, %s1621_s13   ;;  %s1349_s12 = sphi %s1387_s12, %s1620_s12   ;;  %s1345_s11 = sphi %s1385_s11, %s1619_s11   ;;  %s1341_s10 = sphi %s1383_s10, %s1618_s10   ;;  %s1337_s9 = sphi %s1381_s9, %s1617_s9  }
   0x9   : > { %s33_s17 = sadd.s32 1, %s1353_s13  ;;  %s42_s18 = sadd.s32 1, %s1345_s11 }
   0xa   : > { %p35_p0 = scmp.ge.s32.totalorder %s33_s17, 4  ;;  %p49_p1 = scmp.ne.s32.totalorder %s1345_s11, %s1341_s10 }
   0xb   : > { %p50_p2 = scmp.eq.s32.totalorder %s1357_s14, 0  ;;  %p55_p3 = scmp.ne.s32.totalorder %s1341_s10, %s1337_s9 }
   0xc   : > { %s1623_s17 = smov (%p35_p0, %s33_s17), 0  ;;  %p56_p5 = scmp.eq.s32.totalorder %s901_s15, 0 }
   0xd   : > { %p1422_p4 = por %p50_p2, %p49_p1  ;;  %s37_s20 = ssub.s32 %s1353_s13, %s1623_s17 }
   0xe   : > { %p107_p6 = scmp.eq.s32.totalorder %s901_s15, 3  ;;  %p40_p7 = scmp.eq.s32.totalorder %s37_s20, 0 }
   0xf   : > { %p1428_p8 = por %p56_p5, %p55_p3  ;;  %p113_p10 = scmp.eq.s32.totalorder %s902_s16, 3 }
  0x10   : > { %p1432_p9 = por %p107_p6, %p49_p1  ;;  %p1131_p12 = scmp.lt.s32.totalorder %s1357_s14, 4 }
  0x11   : > { %s1437_s23 = scalar_select %p40_p7, %s1345_s11, %s42_s18  }
  0x12   : > { %p1439_p11 = por %p113_p10, %p55_p3  ;;  %s1445_s25 = sand.u32 1, %s1345_s11  }
  0x13   : > { %s905_s26 = sshll.u32 %s1445_s25, 7  ;;  %s968_s27 = sshll.u32 %s1353_s13, 11 }
  0x14   : > { %s145_s30 = scalar_lea.hbm %s1608_s0, %s968_s27  ;;  %s137_s3 = scalar_lea.vmem [#allocation3], %s905_s26 }
  0x15   : > { %s146_s4 = sshll.u32 %s137_s3, 4  ;;  %p1458_p13 = pnand %p1131_p12, %p1422_p4  ;;  %s147_s4 = int_to_ptr.vmem [resolvable:$true] %s146_s4 }
  0x16   : > { %p911_p0 = scmp.ge.s32.totalorder %s1357_s14, 1  ;;  %s134_s6 = scalar_lea.sflag [#allocation4], %s1445_s25 }
  0x17   : > { %p1219_p1 = pneg %p1458_p13  ;;  %s1230_s7 = scalar_lea.vmem %s147_s4, 2048 }
  0x18   : > { %p1231_p2 = scmp.ne.s32.totalorder %s147_s4, %s1230_s7  ;;  %s1359_s8 = smov [#allocation3]  }
  0x19   : > { %s1235_s15 = sshll.u32 %s1359_s8, 4  ;;  %s1236_s15 = int_to_ptr.vmem [resolvable:$false] %s1235_s15 }
  0x1a   : > { %p1233_p3 = pnand %p1231_p2, %p1219_p1  ;;  %s1237_s16 = scalar_lea.vmem %s1236_s15, 4096 }
  0x1b   : > { %p1238_p4 = scmp.lt.s32.totalorder %s147_s4, %s1236_s15  ;;  %p1239_p6 = scmp.lt.s32.totalorder %s1237_s16, %s1230_s7 }
  0x1c   : > { %p1234_p5 = pneg %p1233_p3 }
  0x1d   : > { %p1240_p7 = por %p1239_p6, %p1238_p4 }
  0x1f   : > { %p1241_p10 = pnand %p1240_p7, %p1234_p5 }
  0x21   : > { %1244 = shalt.err (!%p1241_p10)
}
  0x22   : > { %s1360_s18 = smov 64   ;;  %s1361_s19 = smov 4  }
  0x23   : > { %1123 = dma.hbm_to_vmem [thread:$0]  (!%p1458_p13), %s145_s30, 2048, %s147_s4, %s134_s6, %s1360_s18, %s1360_s18, %s1361_s19  }
  0x24   : > { %p177_p12 = scmp.lt.s32.totalorder %s1357_s14, 5  ;;  %s168_s29 = scalar_lea.hbm %s1609_s1, %s968_s27 }
  0x25   : > { %s160_s7 = scalar_lea.vmem [#allocation6], %s905_s26  ;;  %s157_s15 = scalar_lea.sflag [#allocation7], %s1445_s25 }
  0x26   : > { %p1479_p2 = pnand %p911_p0, %p177_p12  ;;  %s169_s8 = sshll.u32 %s160_s7, 4  ;;  %s170_s8 = int_to_ptr.vmem [resolvable:$true] %s169_s8 }
  0x27   : > { %s1258_s16 = scalar_lea.vmem %s170_s8, 2048  ;;  %s1362_s30 = smov [#allocation6]  }
  0x28   : > { %p1259_p3 = scmp.ne.s32.totalorder %s170_s8, %s1258_s16  ;;  %s1263_s4 = sshll.u32 %s1362_s30, 4  ;;  %s1264_s4 = int_to_ptr.vmem [resolvable:$false] %s1263_s4 }
  0x29   : > { %s1265_s27 = scalar_lea.vmem %s1264_s4, 4096  ;;  %p1266_p6 = scmp.lt.s32.totalorder %s170_s8, %s1264_s4 }
  0x2a   : > { %p1261_p5 = pnand %p1259_p3, %p1219_p1  ;;  %p1267_p0 = scmp.lt.s32.totalorder %s1265_s27, %s1258_s16 }
  0x2c   : > { %p1262_p4 = pneg %p1261_p5  ;;  %p1268_p7 = por %p1267_p0, %p1266_p6 }
  0x2e   : > { %p1269_p10 = pnand %p1268_p7, %p1262_p4 }
  0x30   : > { %1272 = shalt.err (!%p1269_p10)
}
  0x31   : > { %1126 = dma.hbm_to_vmem [thread:$0]  (!%p1458_p13), %s168_s29, 2048, %s170_s8, %s157_s15, %s1360_s18, %s1360_s18, %s1361_s19  }
  0x32   : > { %181 = sbr.rel (%p1479_p2) target bundleno = 416 (0x1a0), region = 28  ;;  %s1494_s25 = sand.u32 (!%p1479_p2), 1, %s1341_s10  }
  0x33   : > { %s912_s26 = sshll.u32 (!%p1479_p2), %s1494_s25, 7  ;;  %s184_s6 = scalar_lea.sflag (!%p1479_p2), [#allocation4], %s1494_s25 }
  0x34   : > { %s1498_s20 = scalar_lea.vmem (!%p1479_p2), [#allocation3], %s912_s26 }
  0x37   : > { %1324 = dma.done.wait (%p1428_p8), %s184_s6, 2048  }
  0x38   : > { %1326 = vsyncadd (%p1428_p8), %s184_s6, 4294965248  ;;  %s193_s5 = scalar_lea.sflag [#allocation7], %s1494_s25  ;;  %s1505_s18 = scalar_lea.vmem [#allocation6], %s912_s26 }
  0x39   : > { %1328 = dma.done.wait (%p1428_p8), %s193_s5, 2048  }
  0x3a   : > { %1330 = vsyncadd (%p1428_p8), %s193_s5, 4294965248  ;;  %v1185_v0 = vld [vmem:[%s1498_s20 + $0x40] sm:$0xff]   ;;  %v1187_v2 = vld [vmem:[%s1498_s20 + $0x48] sm:$0xff]   ;;  %s914_s21 = sshll.u32 %s1494_s25, 6  ;;  %s986_s29 = sshll.u32 %s1349_s12, 10 }
  0x3b   : > { %v1186_v1 = vld [vmem:[%s1498_s20] sm:$0xff]   ;;  %437 = vxpose.xlu0.c.b16.start [1/8] %v1185_v0, 128  ;;  %v1188_v3 = vld [vmem:[%s1498_s20 + $0x8] sm:$0xff]   ;;  %v1189_v4 = vld [vmem:[%s1498_s20 + $0x50] sm:$0xff]   ;;  %s1544_s19 = scalar_lea.vmem [#allocation8], %s914_s21  ;;  %s1560_s8 = scalar_lea.hbm %s1610_s2, %s986_s29 }
  0x3c   : > { %421 = vxpose.xlu1.c.b16.start [1/8] %v1186_v1, 128  ;;  %v1190_v5 = vld [vmem:[%s1498_s20 + $0x10] sm:$0xff]   ;;  %v1191_v6 = vld [vmem:[%s1498_s20 + $0x58] sm:$0xff]   ;;  %v1193_v8 = vld [vmem:[%s1498_s20 + $0x60] sm:$0xff]   ;;  %s791_s28 = sshll.u32 %s1544_s19, 4  ;;  %s778_s15 = scalar_lea.sflag [#allocation5], %s1494_s25  ;;  %s1555_s28 = int_to_ptr.vmem [resolvable:$true] %s791_s28 }
  0x3d   : > { %v1192_v7 = vld [vmem:[%s1498_s20 + $0x18] sm:$0xff]   ;;  %v1194_v9 = vld [vmem:[%s1498_s20 + $0x20] sm:$0xff]   ;;  %v1195_v10 = vld [vmem:[%s1498_s20 + $0x68] sm:$0xff]   ;;  %s1273_s16 = scalar_lea.vmem %s1555_s28, 1024  ;;  %s1363_s12 = smov [#allocation8]  }
  0x3e   : > { %v1201_v11 = vld [vmem:[%s1505_s18 + $0x78] sm:$0xff]   ;;  %v1196_v12 = vld [vmem:[%s1498_s20 + $0x28] sm:$0xff]   ;;  %v1203_v14 = vld [vmem:[%s1505_s18 + $0x70] sm:$0xff]   ;;  %p1274_p8 = scmp.ne.s32.totalorder %s1555_s28, %s1273_s16  ;;  %s1277_s30 = sshll.u32 %s1363_s12, 4  ;;  %s1278_s30 = int_to_ptr.vmem [resolvable:$false] %s1277_s30 }
  0x3f   : > { %438 = vxpose.xlu0.c.b16.cont [2/8] %v1187_v2, 128  ;;  %v1202_v13 = vld [vmem:[%s1505_s18 + $0x38] sm:$0xff]   ;;  %1034 = vmatprep.subr.bf16.mxu0 %v1201_v11  ;;  %v1204_v15 = vld [vmem:[%s1505_s18 + $0x30] sm:$0xff]   ;;  %v1205_v16 = vld [vmem:[%s1505_s18 + $0x68] sm:$0xff]   ;;  %s1279_s4 = scalar_lea.vmem %s1278_s30, 2048  ;;  %p1280_p12 = scmp.lt.s32.totalorder %s1555_s28, %s1278_s30 }
  0x40   : > { %422 = vxpose.xlu1.c.b16.cont [2/8] %v1188_v3, 128  ;;  %1035 = vmatpush3.bf16.msra.mxu0 %v1202_v13  ;;  %v1197_v17 = vld [vmem:[%s1498_s20 + $0x70] sm:$0xff]   ;;  %v1206_v19 = vld [vmem:[%s1505_s18 + $0x28] sm:$0xff]   ;;  %v1207_v20 = vld [vmem:[%s1505_s18 + $0x60] sm:$0xff]   ;;  %p1275_p13 = pnand %p1274_p8, %p1432_p9  ;;  %p1281_p2 = scmp.lt.s32.totalorder %s1279_s4, %s1273_s16 }
  0x41   : > { %1036 = vmatprep.subr.bf16.mxu0 %v1203_v14  ;;  %1098 = vmatprep.subr.bf16.mxu1 %v1201_v11  ;;  %v1198_v18 = vld [vmem:[%s1498_s20 + $0x30] sm:$0xff]   ;;  %v1199_v21 = vld [vmem:[%s1498_s20 + $0x78] sm:$0xff]   ;;  %v1208_v23 = vld [vmem:[%s1505_s18 + $0x20] sm:$0xff]  }
  0x42   : > { %1106 = vmatpush3.bf16.msra.mxu1 %v1202_v13  ;;  %v1200_v22 = vld [vmem:[%s1498_s20 + $0x38] sm:$0xff]   ;;  %v1211_v26 = vld [vmem:[%s1505_s18 + $0x50] sm:$0xff]   ;;  %v1213_v28 = vld [vmem:[%s1505_s18 + $0x48] sm:$0xff]   ;;  %p1276_p1 = pneg %p1275_p13  ;;  %p1282_p3 = por %p1281_p2, %p1280_p12 }
  0x43   : > { %439 = vxpose.xlu0.c.b16.cont [3/8] %v1189_v4, 128  ;;  %1099 = vmatprep.subr.bf16.mxu1 %v1203_v14  ;;  %v1209_v24 = vld [vmem:[%s1505_s18 + $0x58] sm:$0xff]   ;;  %v1212_v27 = vld [vmem:[%s1505_s18 + $0x10] sm:$0xff]   ;;  %v1214_v29 = vld [vmem:[%s1505_s18 + $0x8] sm:$0xff]  }
  0x44   : > { %423 = vxpose.xlu1.c.b16.cont [3/8] %v1190_v5, 128  ;;  %1037 = vmatpush3.bf16.msra.mxu0 %v1204_v15  ;;  %v1210_v25 = vld [vmem:[%s1505_s18 + $0x18] sm:$0xff]   ;;  %v1215_v30 = vld [vmem:[%s1505_s18 + $0x40] sm:$0xff]   ;;  %p1283_p5 = pnand %p1282_p3, %p1276_p1 }
  0x45   : > { %1038 = vmatprep.subr.bf16.mxu0 %v1205_v16  ;;  %v1216_v31 = vld [vmem:[%s1505_s18] sm:$0xff]  }
  0x46   : > { %1107 = vmatpush3.bf16.msra.mxu1 %v1204_v15 }
  0x47   : > { %440 = vxpose.xlu0.c.b16.cont [4/8] %v1191_v6, 128  ;;  %1100 = vmatprep.subr.bf16.mxu1 %v1205_v16 }
  0x48   : > { %424 = vxpose.xlu1.c.b16.cont [4/8] %v1192_v7, 128  ;;  %1039 = vmatpush3.bf16.msra.mxu0 %v1206_v19 }
  0x49   : > { %1040 = vmatprep.subr.bf16.mxu0 %v1207_v20 }
  0x4a   : > { %1108 = vmatpush3.bf16.msra.mxu1 %v1206_v19 }
  0x4b   : > { %441 = vxpose.xlu0.c.b16.cont [5/8] %v1193_v8, 128  ;;  %1101 = vmatprep.subr.bf16.mxu1 %v1207_v20 }
  0x4c   : > { %425 = vxpose.xlu1.c.b16.cont [5/8] %v1194_v9, 128  ;;  %1041 = vmatpush3.bf16.msra.mxu0 %v1208_v23 }
  0x4d   : > { %1042 = vmatprep.subr.bf16.mxu0 %v1209_v24 }
  0x4e   : > { %1109 = vmatpush3.bf16.msra.mxu1 %v1208_v23 }
  0x4f   : > { %442 = vxpose.xlu0.c.b16.cont [6/8] %v1195_v10, 128  ;;  %1102 = vmatprep.subr.bf16.mxu1 %v1209_v24 }
  0x50   : > { %426 = vxpose.xlu1.c.b16.cont [6/8] %v1196_v12, 128  ;;  %1043 = vmatpush3.bf16.msra.mxu0 %v1210_v25 }
  0x51   : > { %1044 = vmatprep.subr.bf16.mxu0 %v1211_v26 }
  0x52   : > { %1110 = vmatpush3.bf16.msra.mxu1 %v1210_v25 }
  0x53   : > { %443 = vxpose.xlu0.c.b16.cont [7/8] %v1197_v17, 128  ;;  %1103 = vmatprep.subr.bf16.mxu1 %v1211_v26 }
  0x54   : > { %427 = vxpose.xlu1.c.b16.cont [7/8] %v1198_v18, 128  ;;  %1045 = vmatpush3.bf16.msra.mxu0 %v1212_v27 }
  0x55   : > { %1046 = vmatprep.subr.bf16.mxu0 %v1213_v28 }
  0x56   : > { %1111 = vmatpush3.bf16.msra.mxu1 %v1212_v27 }
  0x57   : > { %444 = vxpose.xlu0.c.b16.end [8/8] %v1199_v21, 128  ;;  %1104 = vmatprep.subr.bf16.mxu1 %v1213_v28 }
  0x58   : > { %428 = vxpose.xlu1.c.b16.end [8/8] %v1200_v22, 128  ;;  %1047 = vmatpush3.bf16.msra.mxu0 %v1214_v29 }
  0x59   : > { %1048 = vmatprep.subr.bf16.mxu0 %v1215_v30 }
  0x5a   : > { %1112 = vmatpush3.bf16.msra.mxu1 %v1214_v29 }
  0x5b   : > { %1105 = vmatprep.subr.bf16.mxu1 %v1215_v30 }
  0x5c   : > { %1049 = vmatpush3.bf16.msra.mxu0 %v1216_v31 }
  0x5e   : > { %1113 = vmatpush3.bf16.msra.mxu1 %v1216_v31 }
  0x9d   : > { %v445_v32 = vpop.trf.xlu0 }
  0x9e   : > { %581 = vmatprep.mubr.bf16.mxu0 %v445_v32  ;;  %v429_v33 = vpop.trf.xlu1 }
  0x9f   : > { %582 = vmatmul.mubr.bf16.vlgmr.msra.gmra.mxu0 %v429_v33 }
  0xa1   : > { %v446_v34 = vpop.trf.xlu0 }
  0xa2   : > { %589 = vmatprep.mubr.bf16.mxu0 %v446_v34  ;;  %v430_v35 = vpop.trf.xlu1 }
  0xa5   : > { %v447_v36 = vpop.trf.xlu0 }
  0xa6   : > { %v431_v37 = vpop.trf.xlu1 }
  0xa7   : > { %590 = vmatmul.mubr.bf16.gmra.mxu0 %v430_v35 }
  0xa8   : > { %597 = vmatprep.mubr.bf16.mxu0 %v447_v36 }
  0xa9   : > { %v448_v38 = vpop.trf.xlu0 }
  0xaa   : > { %v432_v39 = vpop.trf.xlu1 }
  0xad   : > { %v449_v40 = vpop.trf.xlu0 }
  0xae   : > { %613 = vmatprep.mubr.bf16.mxu1 %v449_v40  ;;  %v433_v41 = vpop.trf.xlu1 }
  0xaf   : > { %598 = vmatmul.mubr.bf16.gmra.mxu0 %v431_v37  ;;  %614 = vmatmul.mubr.bf16.vlgmr.msra.gmra.mxu1 %v433_v41 }
  0xb0   : > { %605 = vmatprep.mubr.bf16.mxu0 %v448_v38 }
  0xb1   : > { %v450_v42 = vpop.trf.xlu0 }
  0xb2   : > { %621 = vmatprep.mubr.bf16.mxu1 %v450_v42  ;;  %v434_v43 = vpop.trf.xlu1 }
  0xb5   : > { %v451_v44 = vpop.trf.xlu0 }
  0xb6   : > { %v435_v45 = vpop.trf.xlu1 }
  0xb7   : > { %606 = vmatmul.mubr.bf16.gmra.mxu0 %v432_v39  ;;  %622 = vmatmul.mubr.bf16.gmra.mxu1 %v434_v43 }
  0xb8   : > { %629 = vmatprep.mubr.bf16.mxu1 %v451_v44 }
  0xb9   : > { %v452_v46 = vpop.trf.xlu0 }
  0xba   : > { %v436_v47 = vpop.trf.xlu1 }
  0xbf   : > { %630 = vmatmul.mubr.bf16.gmra.mxu1 %v435_v45 }
  0xc0   : > { %637 = vmatprep.mubr.bf16.mxu1 %v452_v46 }
  0xc7   : > { %638 = vmatmul.mubr.bf16.gmra.mxu1 %v436_v47 }
 0x15f   : > { %v1050_v48 = vpop.f32.mrf.mxu0 }
 0x161   : > { %v1051_v49 = vpop.f32.mrf.mxu0 }
 0x162   : > { %v1052_v52 = vadd.f32 %v1051_v49, %v1050_v48 }
 0x163   : > { %v1053_v50 = vpop.f32.mrf.mxu0 }
 0x165   : > { %v1054_v51 = vpop.f32.mrf.mxu0 }
 0x166   : > { %v1055_v53 = vadd.f32 %v1054_v51, %v1053_v50 }
 0x167   : > { %v1056_v54 = vpop.f32.mrf.mxu0 }
 0x168   : > { %v990_v55 = vpack.c.bf16 %v1055_v53, %v1052_v52 }
 0x169   : > { %v1057_v56 = vpop.f32.mrf.mxu0 }
 0x16a   : > { %991 = vst [vmem:[%s1544_s19] sm:$0xff] %v990_v55   ;;  %v1058_v59 = vadd.f32 %v1057_v56, %v1056_v54 }
 0x16b   : > { %v1059_v57 = vpop.f32.mrf.mxu0 }
 0x16d   : > { %v1060_v58 = vpop.f32.mrf.mxu0 }
 0x16e   : > { %v1061_v60 = vadd.f32 %v1060_v58, %v1059_v57 }
 0x16f   : > { %v1062_v61 = vpop.f32.mrf.mxu0  ;;  %v1074_v62 = vpop.f32.mrf.mxu1 }
 0x170   : > { %v995_v63 = vpack.c.bf16 %v1061_v60, %v1058_v59 }
 0x171   : > { %v1063_v0 = vpop.f32.mrf.mxu0  ;;  %v1075_v1 = vpop.f32.mrf.mxu1 }
 0x172   : > { %1027 = vst [vmem:[%s1544_s19 + $0x8] sm:$0xff] %v995_v63   ;;  %v1064_v6 = vadd.f32 %v1063_v0, %v1062_v61  ;;  %v1076_v7 = vadd.f32 %v1075_v1, %v1074_v62 }
 0x173   : > { %v1065_v2 = vpop.f32.mrf.mxu0  ;;  %v1077_v3 = vpop.f32.mrf.mxu1 }
 0x175   : > { %v1066_v4 = vpop.f32.mrf.mxu0  ;;  %v1078_v5 = vpop.f32.mrf.mxu1 }
 0x176   : > { %v1067_v8 = vadd.f32 %v1066_v4, %v1065_v2  ;;  %v1079_v9 = vadd.f32 %v1078_v5, %v1077_v3 }
 0x177   : > { %v1068_v10 = vpop.f32.mrf.mxu0  ;;  %v1080_v11 = vpop.f32.mrf.mxu1 }
 0x178   : > { %v1000_v12 = vpack.c.bf16 %v1067_v8, %v1064_v6  ;;  %v1010_v13 = vpack.c.bf16 %v1079_v9, %v1076_v7 }
 0x179   : > { %v1069_v14 = vpop.f32.mrf.mxu0  ;;  %v1081_v15 = vpop.f32.mrf.mxu1 }
 0x17a   : > { %1028 = vst [vmem:[%s1544_s19 + $0x10] sm:$0xff] %v1000_v12   ;;  %1030 = vst [vmem:[%s1544_s19 + $0x20] sm:$0xff] %v1010_v13   ;;  %v1070_v20 = vadd.f32 %v1069_v14, %v1068_v10  ;;  %v1082_v21 = vadd.f32 %v1081_v15, %v1080_v11 }
 0x17b   : > { %v1071_v16 = vpop.f32.mrf.mxu0  ;;  %v1083_v17 = vpop.f32.mrf.mxu1 }
 0x17d   : > { %v1072_v18 = vpop.f32.mrf.mxu0  ;;  %v1084_v19 = vpop.f32.mrf.mxu1 }
 0x17e   : > { %v1073_v22 = vadd.f32 %v1072_v18, %v1071_v16  ;;  %v1085_v23 = vadd.f32 %v1084_v19, %v1083_v17 }
 0x17f   : > { %v1086_v24 = vpop.f32.mrf.mxu1 }
 0x180   : > { %v1005_v25 = vpack.c.bf16 %v1073_v22, %v1070_v20  ;;  %v1015_v26 = vpack.c.bf16 %v1085_v23, %v1082_v21 }
 0x181   : > { %v1087_v27 = vpop.f32.mrf.mxu1 }
 0x182   : > { %1029 = vst [vmem:[%s1544_s19 + $0x18] sm:$0xff] %v1005_v25   ;;  %1031 = vst [vmem:[%s1544_s19 + $0x28] sm:$0xff] %v1015_v26   ;;  %v1088_v30 = vadd.f32 %v1087_v27, %v1086_v24 }
 0x183   : > { %v1089_v28 = vpop.f32.mrf.mxu1 }
 0x185   : > { %v1090_v29 = vpop.f32.mrf.mxu1 }
 0x186   : > { %v1091_v31 = vadd.f32 %v1090_v29, %v1089_v28 }
 0x187   : > { %v1092_v32 = vpop.f32.mrf.mxu1 }
 0x188   : > { %v1020_v33 = vpack.c.bf16 %v1091_v31, %v1088_v30 }
 0x189   : > { %v1093_v34 = vpop.f32.mrf.mxu1 }
 0x18a   : > { %1032 = vst [vmem:[%s1544_s19 + $0x30] sm:$0xff] %v1020_v33   ;;  %v1094_v37 = vadd.f32 %v1093_v34, %v1092_v32 }
 0x18b   : > { %v1095_v35 = vpop.f32.mrf.mxu1 }
 0x18d   : > { %v1096_v36 = vpop.f32.mrf.mxu1 }
 0x18e   : > { %v1097_v38 = vadd.f32 %v1096_v36, %v1095_v35 }
 0x190   : > { %v1025_v39 = vpack.c.bf16 %v1097_v38, %v1094_v37 }
 0x192   : > { %1033 = vst [vmem:[%s1544_s19 + $0x38] sm:$0xff] %v1025_v39  }
 0x193   : > { %1286 = shalt.err (!%p1283_p5)
}
 0x194   : > { %s1287_s27 = scalar_lea.hbm %s1560_s8, 1024  ;;  %s1291_s20 = scalar_lea.hbm %s1610_s2, 4096 }
 0x195   : > { %p1288_p4 = scmp.ne.s32.totalorder %s1560_s8, %s1287_s27  ;;  %p1292_p7 = scmp.lt.s32.totalorder %s1560_s8, %s1610_s2 }
 0x196   : > { %p1293_p10 = scmp.lt.s32.totalorder %s1291_s20, %s1287_s27 }
 0x197   : > { %p1289_p6 = pnand %p1288_p4, %p1432_p9 }
 0x198   : > { %p1294_p8 = por %p1293_p10, %p1292_p7 }
 0x199   : > { %p1290_p0 = pneg %p1289_p6 }
 0x19b   : > { %p1295_p13 = pnand %p1294_p8, %p1290_p0 }
 0x19d   : > { %1298 = shalt.err (!%p1295_p13)
}
 0x19e   : > { %s1364_s21 = smov 64   ;;  %s1365_s19 = smov 4  }
 0x19f   : > { %1118 = dma.vmem_to_hbm [thread:$0]  (%p1432_p9), %s1555_s28, 1024, %s1560_s8, %s778_s15, %s1364_s21, %s1364_s21, %s1365_s19  }
 0x1a0 PF: > { %p1132_p1 = scmp.ge.s32.totalorder %s1357_s14, 2  ;;  %s806_s29 = sand.u32 1, %s1337_s9  }
 0x1a1   : > { %s807_s3 = scalar_lea.sflag [#allocation5], %s806_s29 }
 0x1a2   : > { %p1128_p12 = pnand %p1132_p1, %p1439_p11 }
 0x1a4   : > { %p1129_p2 = pneg %p1128_p12 }
 0x1a6   : > { %1332 = dma.done.wait (%p1129_p2), %s807_s3, 1024  }
 0x1a7   : > { %1334 = vsyncadd (%p1129_p2), %s807_s3, 4294966272  ;;  %s21_s14 = sadd.s32 1, %s1357_s14   ;;  %s1617_s9 = smov %s1341_s10 }
 0x1a8   : > { %p18_p3 = scmp.ge.s32.totalorder %s21_s14, 6   ;;  %s1618_s10 = smov %s1345_s11 }
 0x1a9   : > { %s1619_s11 = smov %s1437_s23  ;;  %s1620_s12 = smov %s1353_s13 }
 0x1aa   : > { %s1621_s13 = smov %s1623_s17  ;;  %20 = sbr.rel (!%p18_p3) target bundleno = 8 (0x8), region = 94 }
 0x1af   :  { %812 = vsyncpa [#allocation4], 1 }
 0x1b0   :  { %814 = vsyncpa [#allocation4 + $0x1], 1 }
 0x1b1   :  { %815 = vsyncpa [#allocation7], 1 }
 0x1b2   :  { %817 = vsyncpa [#allocation7 + $0x1], 1 }
 0x1b3   :  { %818 = vsyncpa [#allocation5], 1 }
 0x1b4   :  { %820 = vsyncpa [#allocation5 + $0x1], 1 }

</bundles_post_ra>
